<compile_context>
chip_gen: v5e
topology: v5e:2x2
jax: 0.10.0
libtpu: 0.0.40
codegen_flags: <defaults>
</compile_context>

<pallas_src>
import functools

import jax
import jax.numpy as jnp
from jax.experimental import pallas as pl
from jax.experimental.pallas import tpu as pltpu


def _round_up(x, m):
    return (x + m - 1) // m * m


def _swiglu_mlp_kernel(x_ref, w13_ref, w2_ref, o_ref, acc_ref, *, th):
    # x_ref:   (tm, Dp)        token tile (bf16), resident across the H axis
    # w13_ref: (Dp, 2*th)      fused [w1_block | w3_block] column tile (bf16)
    # w2_ref:  (th, Dp)        down-proj row tile (bf16)
    # o_ref:   (tm, Dp)        output tile
    # acc_ref: (tm, Dp) f32    VMEM accumulator, resident across the H axis
    h = pl.program_id(1)

    @pl.when(h == 0)
    def _():
        acc_ref[...] = jnp.zeros_like(acc_ref)

    x = x_ref[...]
    # One wide MXU matmul -> both gate and up projections, f32 accumulate.
    h13 = jnp.dot(x, w13_ref[...], preferred_element_type=jnp.float32)  # (tm, 2*th)
    h1 = h13[:, :th]
    h3 = h13[:, th:]
    # SiLU gate in f32 (VPU mul/select + EUP sigmoid).
    gated = (h1 * jax.nn.sigmoid(h1)) * h3
    # Down projection for this H block, accumulated in f32.
    acc_ref[...] += jnp.dot(gated.astype(w2_ref.dtype), w2_ref[...],
                            preferred_element_type=jnp.float32)

    @pl.when(h == pl.num_programs(1) - 1)
    def _():
        o_ref[...] = acc_ref[...].astype(o_ref.dtype)


@functools.partial(jax.jit, static_argnames=("tm", "th", "compute_dtype"))
def swiglu_mlp(x, w1, w3, w2, *, tm=256, th=512, compute_dtype=jnp.bfloat16):
    """x: (M, D); w1, w3: (D, H); w2: (H, D). Returns (M, D) in x.dtype.

    Matmuls run in `compute_dtype` (bf16 by default) with f32 accumulation.
    TODO(synk): fp8 weight storage with per-channel dequant for v7x.
    """
    M, D = x.shape
    H = w1.shape[1]
    out_dtype = x.dtype
    cd = compute_dtype

    # Effective tile sizes (don't over-pad tiny problems).
    tm_eff = min(tm, _round_up(M, 8))
    th_eff = min(th, _round_up(H, 256))
    D_pad = _round_up(D, 128)
    M_pad = _round_up(M, tm_eff)
    H_pad = _round_up(H, th_eff)
    nm, nh = M_pad // tm_eff, H_pad // th_eff

    # Zero-pad (zeros contribute exactly zero to every matmul / gate).
    xp = jnp.pad(x.astype(cd), ((0, M_pad - M), (0, D_pad - D)))
    w1p = jnp.pad(w1.astype(cd), ((0, D_pad - D), (0, H_pad - H)))
    w3p = jnp.pad(w3.astype(cd), ((0, D_pad - D), (0, H_pad - H)))
    w2p = jnp.pad(w2.astype(cd), ((0, H_pad - H), (0, D_pad - D)))

    # Pre-block gate/up per H-block: (nh, D_pad, 2*th) so each grid step DMAs one slab.
    w1b = w1p.reshape(D_pad, nh, th_eff).transpose(1, 0, 2)
    w3b = w3p.reshape(D_pad, nh, th_eff).transpose(1, 0, 2)
    w13 = jnp.concatenate([w1b, w3b], axis=-1)  # (nh, D_pad, 2*th_eff)

    bpe = jnp.dtype(cd).itemsize
    out_bpe = jnp.dtype(out_dtype).itemsize
    # Double-buffered tiles + f32 accumulator, with ~25% headroom.
    tile_bytes = (tm_eff * D_pad * bpe            # x tile
                  + D_pad * 2 * th_eff * bpe      # fused w1/w3 tile
                  + th_eff * D_pad * bpe          # w2 tile
                  + tm_eff * D_pad * out_bpe)     # output tile
    vmem_limit = int(2 * tile_bytes * 1.25) + tm_eff * D_pad * 4 + (1 << 20)
    vmem_limit = min(max(vmem_limit, 4 << 20), 100 << 20)

    cost = pl.CostEstimate(
        flops=6 * M_pad * D_pad * H_pad,
        transcendentals=M_pad * H_pad,
        bytes_accessed=(xp.size + w13.size + w2p.size) * bpe
                       + M_pad * D_pad * out_bpe,
    )

    out = pl.pallas_call(
        functools.partial(_swiglu_mlp_kernel, th=th_eff),
        out_shape=jax.ShapeDtypeStruct((M_pad, D_pad), out_dtype),
        grid_spec=pltpu.PrefetchScalarGridSpec(
            num_scalar_prefetch=0,
            grid=(nm, nh),                                   # M parallel, H reduction last
            in_specs=[
                pl.BlockSpec((tm_eff, D_pad), lambda i, h: (i, 0)),
                pl.BlockSpec((None, D_pad, 2 * th_eff), lambda i, h: (h, 0, 0)),
                pl.BlockSpec((th_eff, D_pad), lambda i, h: (h, 0)),
            ],
            out_specs=pl.BlockSpec((tm_eff, D_pad), lambda i, h: (i, 0)),
            scratch_shapes=[pltpu.VMEM((tm_eff, D_pad), jnp.float32)],
        ),
        compiler_params=pltpu.CompilerParams(
            dimension_semantics=("parallel", "arbitrary"),
            vmem_limit_bytes=vmem_limit,
        ),
        cost_estimate=cost,
    )(xp, w13, w2p)

    return out[:M, :D]


def compute_hidden_dim(dim, multiple_of=32, ffn_dim_multiplier=None):
    # Mirrors MLP.__init__ (called with hidden_dim = 4*dim at the LLaMA call site).
    hidden_dim = 4 * dim
    hidden_dim = int(2 * hidden_dim / 3)
    if ffn_dim_multiplier is not None:
        hidden_dim = int(ffn_dim_multiplier * hidden_dim)
    hidden_dim = multiple_of * ((hidden_dim + multiple_of - 1) // multiple_of)
    return hidden_dim


def reference_mlp(x, w1, w3, w2, compute_dtype=jnp.bfloat16):
    # Pure-JAX reference mirroring the kernel's numerics (bf16 operands, f32 accum,
    # f32 SiLU, bf16 gated activation fed into the down projection).
    f32 = jnp.float32
    xc = x.astype(compute_dtype).astype(f32)
    w1c = w1.astype(compute_dtype).astype(f32)
    w3c = w3.astype(compute_dtype).astype(f32)
    w2c = w2.astype(compute_dtype).astype(f32)
    h1 = xc @ w1c
    h3 = xc @ w3c
    gated = (h1 * jax.nn.sigmoid(h1) * h3).astype(compute_dtype).astype(f32)
    return (gated @ w2c).astype(x.dtype)


if __name__ == "__main__":
    # Small shapes: batch=2, seq=8, dim=64, multiple_of=32 -> hidden=192
    batch, seq, dim = 2, 8, 64
    hidden = compute_hidden_dim(dim, multiple_of=32, ffn_dim_multiplier=None)  # 192

    key = jax.random.PRNGKey(0)
    kx, k1, k3, k2 = jax.random.split(key, 4)

    x = jax.random.normal(kx, (batch, seq, dim), dtype=jnp.float32)
    # Deterministic "Kaiming-uniform-like" init, stored (in, out) so kernel does x @ W.
    w1 = jax.random.normal(k1, (dim, hidden), dtype=jnp.float32) * (1.0 / dim ** 0.5)
    w3 = jax.random.normal(k3, (dim, hidden), dtype=jnp.float32) * (1.0 / dim ** 0.5)
    w2 = jax.random.normal(k2, (hidden, dim), dtype=jnp.float32) * (1.0 / hidden ** 0.5)

    x2d = x.reshape(batch * seq, dim)
    out = swiglu_mlp(x2d, w1, w3, w2)
    out = jax.block_until_ready(out).reshape(batch, seq, dim)

    ref = reference_mlp(x2d, w1, w3, w2).reshape(batch, seq, dim)
    assert out.shape == (batch, seq, dim)
    assert jnp.allclose(out, ref, atol=2e-2, rtol=2e-2), "mismatch vs reference"

    print("KERNEL_OK")
</pallas_src>

<mosaic_0001>
module attributes {stable_mosaic.version = 11 : i64} {
  func.func @_swiglu_mlp_kernel(%arg0: i32, %arg1: i32, %arg2: memref<16x128xbf16, #tpu.memory_space<vmem>>, %arg3: memref<1x128x512xbf16, #tpu.memory_space<vmem>>, %arg4: memref<256x128xbf16, #tpu.memory_space<vmem>>, %arg5: memref<16x128xf32, #tpu.memory_space<vmem>>, %arg6: memref<16x128xf32, #tpu.memory_space<vmem>>) attributes {dimension_semantics = [#tpu.dimension_semantics<parallel>, #tpu.dimension_semantics<arbitrary>], iteration_bounds = array<i64: 1, 1>, scalar_prefetch = 0 : i64, scratch_operands = 1 : i64, tpu.core_type = #tpu.core_type<tc>, window_params = [{transform_indices = @transform_0, window_bounds = array<i64: 16, 128>}, {transform_indices = @transform_1, window_bounds = array<i64: 1, 128, 512>}, {transform_indices = @transform_2, window_bounds = array<i64: 256, 128>}, {transform_indices = @transform_3, window_bounds = array<i64: 16, 128>}]} {
    %c0_i32 = arith.constant 0 : i32
    %0 = arith.cmpi eq, %arg1, %c0_i32 : i32
    %1 = arith.extui %0 : i1 to i32
    %c0_i32_0 = arith.constant 0 : i32
    %2 = arith.cmpi ne, %1, %c0_i32_0 : i32
    scf.if %2 {
      %cst_15 = arith.constant 0.000000e+00 : f32
      %25 = vector.broadcast %cst_15 : f32 to vector<16x128xf32>
      %c0_16 = arith.constant 0 : index
      %c0_17 = arith.constant 0 : index
      %26 = vector.load %arg6[%c0_16, %c0_17] : memref<16x128xf32, #tpu.memory_space<vmem>>, vector<16x128xf32>
      tpu.vector_store %arg6[%c0_16, %c0_17], %25 {strides = array<i32>} : memref<16x128xf32, #tpu.memory_space<vmem>>, vector<16x128xf32>,
    } else {
    }
    %c0 = arith.constant 0 : index
    %c0_1 = arith.constant 0 : index
    %3 = vector.load %arg2[%c0, %c0_1] : memref<16x128xbf16, #tpu.memory_space<vmem>>, vector<16x128xbf16>
    %c0_2 = arith.constant 0 : index
    %c0_3 = arith.constant 0 : index
    %c0_4 = arith.constant 0 : index
    %4 = vector.load %arg3[%c0_2, %c0_3, %c0_4] : memref<1x128x512xbf16, #tpu.memory_space<vmem>>, vector<1x128x512xbf16>
    %5 = vector.shape_cast %4 : vector<1x128x512xbf16> to vector<128x512xbf16>
    %cst = arith.constant dense<0.000000e+00> : vector<16x512xf32>
    %6 = tpu.matmul %3, %5, %cst {dimension_numbers = #tpu.dot_dimension_numbers<[1], [0], [0], [1], [0, 0, 1, 1], [], []>} : vector<16x128xbf16>, vector<128x512xbf16>, vector<16x512xf32> -> vector<16x512xf32>
    %7 = vector.extract_strided_slice %6 {offsets = [0, 0], sizes = [16, 256], strides = [1, 1]} : vector<16x512xf32> to vector<16x256xf32>
    %8 = vector.extract_strided_slice %6 {offsets = [0, 256], sizes = [16, 256], strides = [1, 1]} : vector<16x512xf32> to vector<16x256xf32>
    %9 = arith.negf %7 : vector<16x256xf32>
    %10 = math.exp %9 : vector<16x256xf32>
    %cst_5 = arith.constant 1.000000e+00 : f32
    %11 = vector.broadcast %cst_5 : f32 to vector<16x256xf32>
    %12 = arith.addf %11, %10 : vector<16x256xf32>
    %13 = arith.divf %11, %12 : vector<16x256xf32>
    %14 = arith.mulf %7, %13 : vector<16x256xf32>
    %15 = arith.mulf %14, %8 : vector<16x256xf32>
    %c0_6 = arith.constant 0 : index
    %c0_7 = arith.constant 0 : index
    %16 = vector.load %arg6[%c0_6, %c0_7] : memref<16x128xf32, #tpu.memory_space<vmem>>, vector<16x128xf32>
    %17 = arith.truncf %15 : vector<16x256xf32> to vector<16x256xbf16>
    %c0_8 = arith.constant 0 : index
    %c0_9 = arith.constant 0 : index
    %18 = vector.load %arg4[%c0_8, %c0_9] : memref<256x128xbf16, #tpu.memory_space<vmem>>, vector<256x128xbf16>
    %cst_10 = arith.constant dense<0.000000e+00> : vector<16x128xf32>
    %19 = tpu.matmul %17, %18, %cst_10 {dimension_numbers = #tpu.dot_dimension_numbers<[1], [0], [0], [1], [0, 0, 1, 1], [], []>} : vector<16x256xbf16>, vector<256x128xbf16>, vector<16x128xf32> -> vector<16x128xf32>
    %20 = arith.addf %16, %19 : vector<16x128xf32>
    %c0_11 = arith.constant 0 : index
    %c0_12 = arith.constant 0 : index
    %21 = vector.load %arg6[%c0_11, %c0_12] : memref<16x128xf32, #tpu.memory_space<vmem>>, vector<16x128xf32>
    tpu.vector_store %arg6[%c0_11, %c0_12], %20 {strides = array<i32>} : memref<16x128xf32, #tpu.memory_space<vmem>>, vector<16x128xf32>,
    %c0_i32_13 = arith.constant 0 : i32
    %22 = arith.cmpi eq, %arg1, %c0_i32_13 : i32
    %23 = arith.extui %22 : i1 to i32
    %c0_i32_14 = arith.constant 0 : i32
    %24 = arith.cmpi ne, %23, %c0_i32_14 : i32
    scf.if %24 {
      %c0_15 = arith.constant 0 : index
      %c0_16 = arith.constant 0 : index
      %25 = vector.load %arg6[%c0_15, %c0_16] : memref<16x128xf32, #tpu.memory_space<vmem>>, vector<16x128xf32>
      %c0_17 = arith.constant 0 : index
      %c0_18 = arith.constant 0 : index
      %26 = vector.load %arg5[%c0_17, %c0_18] : memref<16x128xf32, #tpu.memory_space<vmem>>, vector<16x128xf32>
      tpu.vector_store %arg5[%c0_17, %c0_18], %25 {strides = array<i32>} : memref<16x128xf32, #tpu.memory_space<vmem>>, vector<16x128xf32>,
    } else {
    }
    return
  }
  func.func @transform_0(%arg0: i32, %arg1: i32) -> (i32, i32) {
    %c0_i32 = arith.constant 0 : i32
    %c0_i32_0 = arith.constant 0 : i32
    return %arg0, %c0_i32 : i32, i32
  }
  func.func @transform_1(%arg0: i32, %arg1: i32) -> (i32, i32, i32) {
    %c0_i32 = arith.constant 0 : i32
    %c0_i32_0 = arith.constant 0 : i32
    %c0_i32_1 = arith.constant 0 : i32
    return %arg1, %c0_i32, %c0_i32_0 : i32, i32, i32
  }
  func.func @transform_2(%arg0: i32, %arg1: i32) -> (i32, i32) {
    %c0_i32 = arith.constant 0 : i32
    %c0_i32_0 = arith.constant 0 : i32
    return %arg1, %c0_i32 : i32, i32
  }
  func.func @transform_3(%arg0: i32, %arg1: i32) -> (i32, i32) {
    %c0_i32 = arith.constant 0 : i32
    %c0_i32_0 = arith.constant 0 : i32
    return %arg0, %c0_i32 : i32, i32
  }
}

</mosaic_0001>

<bundles_post_ra>
// kernel: swiglu_mlp.1
= control target key start
LH: loop header
LB: loop body
LE: loop exit
PB: predicated region body
PF: predicated region fallthrough
CT: control target
= control target key end

     0   :  { %s1141_s0 = inlined_call_operand.vmem [shape: bf16[16,128], index: 0, kind: input, shape index: {}]   ;;  %s1142_s1 = inlined_call_operand.vmem [shape: bf16[1,128,512], index: 1, kind: input, shape index: {}]   ;;  %s1143_s2 = inlined_call_operand.vmem [shape: bf16[256,128], index: 2, kind: input, shape index: {}]   ;;  %s1144_s3 = inlined_call_operand.hbm [shape: f32[16,128], index: 3, kind: output, shape index: {}]  }
   0x1   :  { %v668_v0 = vld [vmem:[%s1142_s1 + $0xe0] sm:$0xf]  ;;  %v781_v1 = vld [vmem:[%s1142_s1 + $0xec] sm:$0xf0]  ;;  %v779_v2 = vld [vmem:[%s1142_s1 + $0xe4] sm:$0xf] }
   0x2   :  { %v669_v3 = vor.u32 %v781_v1, %v668_v0  ;;  %v670_v4 = vld [vmem:[%s1142_s1 + $0xf0] sm:$0xf0]  ;;  %v652_v5 = vld [vmem:[%s1142_s1 + $0xc0] sm:$0xf]  ;;  %v777_v6 = vld [vmem:[%s1142_s1 + $0xcc] sm:$0xf0] }
   0x3   :  { %v673_v7 = vor.u32 %v779_v2, %v670_v4  ;;  %v775_v8 = vld [vmem:[%s1142_s1 + $0xc4] sm:$0xf]  ;;  %v654_v9 = vld [vmem:[%s1142_s1 + $0xd0] sm:$0xf0]  ;;  %v653_v10 = vor.u32 %v777_v6, %v652_v5  ;;  %v636_v12 = vld [vmem:[%s1142_s1 + $0xa0] sm:$0xf] }
   0x4   :  { %221 = vmatpush.bf16.msra.mxu0 %v669_v3  ;;  %v657_v11 = vor.u32 %v775_v8, %v654_v9  ;;  %v773_v13 = vld [vmem:[%s1142_s1 + $0xac] sm:$0xf0]  ;;  %v771_v14 = vld [vmem:[%s1142_s1 + $0xa4] sm:$0xf]  ;;  %v638_v15 = vld [vmem:[%s1142_s1 + $0xb0] sm:$0xf0] }
   0x5   :  { %235 = vmatpush.bf16.msra.mxu1 %v673_v7  ;;  %v676_v16 = vld [vmem:[%s1142_s1 + $0xe8] sm:$0xf]  ;;  %v637_v17 = vor.u32 %v773_v13, %v636_v12  ;;  %v782_v18 = vld [vmem:[%s1142_s1 + $0xf4] sm:$0xf0]  ;;  %v780_v19 = vld [vmem:[%s1142_s1 + $0xec] sm:$0xf]  ;;  %v641_v21 = vor.u32 %v771_v14, %v638_v15 }
   0x6   :  { %v678_v20 = vld [vmem:[%s1142_s1 + $0xf8] sm:$0xf0]  ;;  %v620_v22 = vld [vmem:[%s1142_s1 + $0x80] sm:$0xf]  ;;  %v769_v23 = vld [vmem:[%s1142_s1 + $0x8c] sm:$0xf0]  ;;  %v677_v25 = vor.u32 %v782_v18, %v676_v16 }
   0x7   :  { %v767_v24 = vld [vmem:[%s1142_s1 + $0x84] sm:$0xf]  ;;  %v681_v26 = vor.u32 %v780_v19, %v678_v20  ;;  %v622_v27 = vld [vmem:[%s1142_s1 + $0x90] sm:$0xf0]  ;;  %v660_v28 = vld [vmem:[%s1142_s1 + $0xc8] sm:$0xf]  ;;  %v621_v33 = vor.u32 %v769_v23, %v620_v22 }
   0x8   :  { %222 = vmatpush.bf16.msra.mxu0 %v653_v10  ;;  %v778_v29 = vld [vmem:[%s1142_s1 + $0xd4] sm:$0xf0]  ;;  %249 = vmatpush.bf16.msra.mxu2 %v677_v25  ;;  %v776_v31 = vld [vmem:[%s1142_s1 + $0xcc] sm:$0xf]  ;;  %v662_v32 = vld [vmem:[%s1142_s1 + $0xd8] sm:$0xf0]  ;;  %v625_v37 = vor.u32 %v767_v24, %v622_v27 }
   0x9   :  { %236 = vmatpush.bf16.msra.mxu1 %v657_v11  ;;  %263 = vmatpush.bf16.msra.mxu3 %v681_v26  ;;  %v661_v30 = vor.u32 %v778_v29, %v660_v28  ;;  %v604_v34 = vld [vmem:[%s1142_s1 + $0x60] sm:$0xf]  ;;  %v765_v35 = vld [vmem:[%s1142_s1 + $0x6c] sm:$0xf0]  ;;  %v665_v36 = vor.u32 %v776_v31, %v662_v32  ;;  %v644_v38 = vld [vmem:[%s1142_s1 + $0xa8] sm:$0xf] }
   0xa   :  { %v774_v39 = vld [vmem:[%s1142_s1 + $0xb4] sm:$0xf0]  ;;  %v772_v40 = vld [vmem:[%s1142_s1 + $0xac] sm:$0xf]  ;;  %v763_v41 = vld [vmem:[%s1142_s1 + $0x64] sm:$0xf]  ;;  %v605_v47 = vor.u32 %v765_v35, %v604_v34 }
   0xb   :  { %v606_v42 = vld [vmem:[%s1142_s1 + $0x70] sm:$0xf0]  ;;  %v646_v43 = vld [vmem:[%s1142_s1 + $0xb8] sm:$0xf0]  ;;  %v645_v44 = vor.u32 %v774_v39, %v644_v38  ;;  %v628_v46 = vld [vmem:[%s1142_s1 + $0x88] sm:$0xf] }
   0xc   :  { %223 = vmatpush.bf16.msra.mxu0 %v637_v17  ;;  %250 = vmatpush.bf16.msra.mxu2 %v661_v30  ;;  %v649_v45 = vor.u32 %v772_v40, %v646_v43  ;;  %v770_v48 = vld [vmem:[%s1142_s1 + $0x94] sm:$0xf0]  ;;  %v768_v49 = vld [vmem:[%s1142_s1 + $0x8c] sm:$0xf]  ;;  %v630_v50 = vld [vmem:[%s1142_s1 + $0x98] sm:$0xf0]  ;;  %v609_v51 = vor.u32 %v763_v41, %v606_v42 }
   0xd   :  { %237 = vmatpush.bf16.msra.mxu1 %v641_v21  ;;  %264 = vmatpush.bf16.msra.mxu3 %v665_v36  ;;  %v588_v52 = vld [vmem:[%s1142_s1 + $0x40] sm:$0xf]  ;;  %v761_v53 = vld [vmem:[%s1142_s1 + $0x4c] sm:$0xf0]  ;;  %v759_v54 = vld [vmem:[%s1142_s1 + $0x44] sm:$0xf]  ;;  %v629_v56 = vor.u32 %v770_v48, %v628_v46  ;;  %v633_v57 = vor.u32 %v768_v49, %v630_v50 }
   0xe   :  { %v590_v55 = vld [vmem:[%s1142_s1 + $0x50] sm:$0xf0]  ;;  %v612_v58 = vld [vmem:[%s1142_s1 + $0x68] sm:$0xf]  ;;  %v589_v59 = vor.u32 %v761_v53, %v588_v52  ;;  %v766_v60 = vld [vmem:[%s1142_s1 + $0x74] sm:$0xf0] }
   0xf   :  { %v764_v61 = vld [vmem:[%s1142_s1 + $0x6c] sm:$0xf]  ;;  %v614_v62 = vld [vmem:[%s1142_s1 + $0x78] sm:$0xf0]  ;;  %v593_v63 = vor.u32 %v759_v54, %v590_v55  ;;  %v572_v0 = vld [vmem:[%s1142_s1 + $0x20] sm:$0xf] }
  0x10   :  { %224 = vmatpush.bf16.msra.mxu0 %v621_v33  ;;  %251 = vmatpush.bf16.msra.mxu2 %v645_v44  ;;  %v757_v1 = vld [vmem:[%s1142_s1 + $0x2c] sm:$0xf0]  ;;  %v755_v2 = vld [vmem:[%s1142_s1 + $0x24] sm:$0xf]  ;;  %v574_v3 = vld [vmem:[%s1142_s1 + $0x30] sm:$0xf0] }
  0x11   :  { %238 = vmatpush.bf16.msra.mxu1 %v625_v37  ;;  %265 = vmatpush.bf16.msra.mxu3 %v649_v45 }
  0x14   :  { %225 = vmatpush.bf16.msra.mxu0 %v605_v47 }
  0x15   :  { %239 = vmatpush.bf16.msra.mxu1 %v609_v51 }
  0x16   :  { %8 = vsyncpa [#allocation4], 0  ;;  %252 = vmatpush.bf16.msra.mxu2 %v629_v56  ;;  %266 = vmatpush.bf16.msra.mxu3 %v633_v57  ;;  %v613_v4 = vor.u32 %v766_v60, %v612_v58  ;;  %v617_v5 = vor.u32 %v764_v61, %v614_v62  ;;  %v596_v6 = vld [vmem:[%s1142_s1 + $0x48] sm:$0xf]  ;;  %v573_v7 = vor.u32 %v757_v1, %v572_v0  ;;  %v762_v8 = vld [vmem:[%s1142_s1 + $0x54] sm:$0xf0] }
  0x17   :  { %v760_v9 = vld [vmem:[%s1142_s1 + $0x4c] sm:$0xf]  ;;  %v598_v10 = vld [vmem:[%s1142_s1 + $0x58] sm:$0xf0]  ;;  %v577_v11 = vor.u32 %v755_v2, %v574_v3  ;;  %v556_v12 = vld [vmem:[%s1142_s1] sm:$0xf]  ;;  %v597_v16 = vor.u32 %v762_v8, %v596_v6 }
  0x18   :  { %226 = vmatpush.bf16.msra.mxu0 %v589_v59  ;;  %v753_v13 = vld [vmem:[%s1142_s1 + $0xc] sm:$0xf0]  ;;  %v751_v14 = vld [vmem:[%s1142_s1 + $0x4] sm:$0xf]  ;;  %v558_v15 = vld [vmem:[%s1142_s1 + $0x10] sm:$0xf0]  ;;  %v601_v17 = vor.u32 %v760_v9, %v598_v10 }
  0x19   :  { %240 = vmatpush.bf16.msra.mxu1 %v593_v63  ;;  %v557_v18 = vor.u32 %v753_v13, %v556_v12  ;;  %v580_v19 = vld [vmem:[%s1142_s1 + $0x28] sm:$0xf]  ;;  %v758_v20 = vld [vmem:[%s1142_s1 + $0x34] sm:$0xf0]  ;;  %v561_v21 = vor.u32 %v751_v14, %v558_v15  ;;  %v756_v22 = vld [vmem:[%s1142_s1 + $0x2c] sm:$0xf] }
  0x1a   :  { %253 = vmatpush.bf16.msra.mxu2 %v613_v4  ;;  %267 = vmatpush.bf16.msra.mxu3 %v617_v5  ;;  %v582_v23 = vld [vmem:[%s1142_s1 + $0x38] sm:$0xf0]  ;;  %v750_v24 = vld [vmem:[%s1141_s0] sm:$0xff]  ;;  %v581_v25 = vor.u32 %v758_v20, %v580_v19  ;;  %v564_v27 = vld [vmem:[%s1142_s1 + $0x8] sm:$0xf]  ;;  %s538_s11 = sshll.u32 %s1144_s3, 4  ;;  %s539_s11 = int_to_ptr.hbm [resolvable:$true] %s538_s11 }
  0x1b   :  { %v585_v26 = vor.u32 %v756_v22, %v582_v23  ;;  %v754_v28 = vld [vmem:[%s1142_s1 + $0x14] sm:$0xf0]  ;;  %v752_v29 = vld [vmem:[%s1142_s1 + $0xc] sm:$0xf]  ;;  %v566_v30 = vld [vmem:[%s1142_s1 + $0x18] sm:$0xf0] }
  0x1c   :  { %227 = vmatpush.bf16.msra.mxu0 %v573_v7  ;;  %v565_v31 = vor.u32 %v754_v28, %v564_v27  ;;  %v569_v32 = vor.u32 %v752_v29, %v566_v30  ;;  %v790_v33 = vld [vmem:[%s1143_s2 + $0x38] sm:$0xff]  ;;  %v789_v35 = vld [vmem:[%s1143_s2 + $0x30] sm:$0xff]  ;;  %v788_v37 = vld [vmem:[%s1143_s2 + $0x28] sm:$0xff]  ;;  %s845_s12 = smov 128   ;;  %s846_s13 = smov 8  }
  0x1d   :  { %241 = vmatpush.bf16.msra.mxu1 %v577_v11  ;;  %v798_v34 = vld [vmem:[%s1143_s2 + $0x78] sm:$0xff]  ;;  %v797_v36 = vld [vmem:[%s1143_s2 + $0x70] sm:$0xff]  ;;  %v796_v38 = vld [vmem:[%s1143_s2 + $0x68] sm:$0xff] }
  0x1e   :  { %254 = vmatpush.bf16.msra.mxu2 %v597_v16  ;;  %268 = vmatpush.bf16.msra.mxu3 %v601_v17  ;;  %v787_v39 = vld [vmem:[%s1143_s2 + $0x20] sm:$0xff]  ;;  %v786_v41 = vld [vmem:[%s1143_s2 + $0x18] sm:$0xff]  ;;  %v785_v47 = vld [vmem:[%s1143_s2 + $0x10] sm:$0xff] }
  0x1f   :  { %v795_v40 = vld [vmem:[%s1143_s2 + $0x60] sm:$0xff]  ;;  %v794_v42 = vld [vmem:[%s1143_s2 + $0x58] sm:$0xff]  ;;  %v793_v48 = vld [vmem:[%s1143_s2 + $0x50] sm:$0xff] }
  0x20   :  { %228 = vmatpush.bf16.msra.mxu0 %v557_v18  ;;  %v784_v49 = vld [vmem:[%s1143_s2 + $0x8] sm:$0xff]  ;;  %v783_v58 = vld [vmem:[%s1143_s2] sm:$0xff] }
  0x21   :  { %242 = vmatpush.bf16.msra.mxu1 %v561_v21  ;;  %v792_v50 = vld [vmem:[%s1143_s2 + $0x48] sm:$0xff]  ;;  %v791_v59 = vld [vmem:[%s1143_s2 + $0x40] sm:$0xff]  ;;  %s844_s2 = smov [#allocation3]  }
  0x22   :  { %255 = vmatpush.bf16.msra.mxu2 %v581_v25  ;;  %269 = vmatpush.bf16.msra.mxu3 %v585_v26  ;;  %s536_s9 = sshll.u32 %s844_s2, 4  ;;  %s537_s9 = int_to_ptr.vmem [resolvable:$true] %s536_s9 }
  0x23   :  { %229 = vmatmul.bf16.vlgmr.msra.gmra.mxu0 %v750_v24 }
  0x24   :  { %243 = vmatmul.bf16.vlgmr.msra.gmra.mxu1 %v750_v24  ;;  %493 = vmatpush.bf16.msrb.mxu0 %v790_v33 }
  0x25   :  { %507 = vmatpush.bf16.msrb.mxu1 %v798_v34 }
  0x26   :  { %256 = vmatpush.bf16.msra.mxu2 %v565_v31  ;;  %270 = vmatpush.bf16.msra.mxu3 %v569_v32 }
  0x28   :  { %494 = vmatpush.bf16.msrb.mxu0 %v789_v35 }
  0x29   :  { %257 = vmatmul.bf16.vlgmr.msra.gmra.mxu2 %v750_v24  ;;  %271 = vmatmul.bf16.vlgmr.msra.gmra.mxu3 %v750_v24 }
  0x2a   :  { %508 = vmatpush.bf16.msrb.mxu1 %v797_v36 }
  0x2c   :  { %495 = vmatpush.bf16.msrb.mxu0 %v788_v37 }
  0x2e   :  { %509 = vmatpush.bf16.msrb.mxu1 %v796_v38 }
  0x30   :  { %496 = vmatpush.bf16.msrb.mxu0 %v787_v39 }
  0x32   :  { %510 = vmatpush.bf16.msrb.mxu1 %v795_v40 }
  0x34   :  { %497 = vmatpush.bf16.msrb.mxu0 %v786_v41 }
  0x36   :  { %511 = vmatpush.bf16.msrb.mxu1 %v794_v42 }
  0x38   :  { %498 = vmatpush.bf16.msrb.mxu0 %v785_v47 }
  0x3a   :  { %512 = vmatpush.bf16.msrb.mxu1 %v793_v48 }
  0x3c   :  { %499 = vmatpush.bf16.msrb.mxu0 %v784_v49 }
  0x3e   :  { %513 = vmatpush.bf16.msrb.mxu1 %v792_v50 }
  0x40   :  { %500 = vmatpush.bf16.msrb.mxu0 %v783_v58 }
  0x42   :  { %514 = vmatpush.bf16.msrb.mxu1 %v791_v59 }
  0xa0   :  { %v1092_v43 = vpop.f32.mrf.mxu0 }
  0xa1   :  { %v682_v44 = vmul.f32 -1.442695, %v1092_v43  ;;  %v1095_v45 = vpop.f32.mrf.mxu1 }
  0xa2   :  { %v683_v46 = vmul.f32 -1.442695, %v1095_v45 }
  0xa3   :  { %802 = vpow2.f32 %v682_v44 }
  0xa4   :  { %804 = vpow2.f32 %v683_v46 }
  0xa8   :  { %v1110_v51 = vpop.f32.mrf.mxu0 }
  0xa9   :  { %v803_v52 = vpop.eup %802  ;;  %v684_v53 = vmul.f32 -1.442695, %v1110_v51  ;;  %v1113_v54 = vpop.f32.mrf.mxu1 }
  0xaa   :  { %v805_v55 = vpop.eup %804  ;;  %v289_v56 = vadd.f32 1.0, %v803_v52  ;;  %v685_v57 = vmul.f32 -1.442695, %v1113_v54 }
  0xab   :  { %v290_v60 = vadd.f32 1.0, %v805_v55  ;;  %806 = vpow2.f32 %v684_v53 }
  0xac   :  { %808 = vrcp.f32 %v289_v56  ;;  %v304_v11 = vand.u32 2147483648, %v289_v56  ;;  %vm298_vm1 = vweird.f32 %v289_v56  ;;  %v302_v12 = vand.u32 2147483647, %v289_v56  ;;  %v258_v17 = vpop.f32.mrf.mxu2  ;;  %v272_v28 = vpop.f32.mrf.mxu3 }
  0xad   :  { %810 = vrcp.f32 %v290_v60  ;;  %v317_v16 = vand.u32 2147483647, %v290_v60  ;;  %v319_v20 = vand.u32 2147483648, %v290_v60  ;;  %vm313_vm4 = vweird.f32 %v290_v60 }
  0xae   :  { %812 = vpow2.f32 %v685_v57  ;;  %v305_v22 = vor.u32 1.1754944e-38, %v304_v11  ;;  %vm303_vm5 = vcmp.eq.f32.partialorder %v302_v12, 8.507059e+37 }
  0xaf   :  { %vm318_vm8 = vcmp.eq.f32.partialorder %v317_v16, 8.507059e+37  ;;  %v320_v32 = vor.u32 1.1754944e-38, %v319_v20 }
  0xb1   :  { %v807_v61 = vpop.eup %806 }
  0xb2   :  { %v809_v62 = vpop.eup %808  ;;  %v291_v63 = vadd.f32 1.0, %v807_v61 }
  0xb3   :  { %v811_v0 = vpop.eup %810  ;;  %v294_v1 = vmul.f32 %v809_v62, %v289_v56  ;;  %vm299_vm0 = vweird.f32 %v809_v62 }
  0xb4   :  { %v813_v2 = vpop.eup %812  ;;  %v309_v3 = vmul.f32 %v811_v0, %v290_v60  ;;  %814 = vrcp.f32 %v291_v63  ;;  %vm1122_vm2 = vmor %vm298_vm1, %vm299_vm0  ;;  %vm314_vm3 = vweird.f32 %v811_v0  ;;  %v334_v23 = vand.u32 2147483648, %v291_v63  ;;  %v260_v49 = vpop.f32.mrf.mxu2 }
  0xb5   :  { %v295_v4 = vsub.f32 1.0, %v294_v1  ;;  %v292_v5 = vadd.f32 1.0, %v813_v2  ;;  %vm1128_vm6 = vmor %vm313_vm4, %vm314_vm3  ;;  %v332_v27 = vand.u32 2147483647, %v291_v63  ;;  %vm328_vm9 = vweird.f32 %v291_v63  ;;  %v274_v56 = vpop.f32.mrf.mxu3 }
  0xb6   :  { %v310_v6 = vsub.f32 1.0, %v309_v3  ;;  %v335_v35 = vor.u32 1.1754944e-38, %v334_v23 }
  0xb7   :  { %v296_v7 = vmul.f32 %v809_v62, %v295_v4  ;;  %816 = vrcp.f32 %v292_v5  ;;  %v349_v34 = vand.u32 2147483648, %v292_v5  ;;  %v347_v37 = vand.u32 2147483647, %v292_v5 }
  0xb8   :  { %v311_v8 = vmul.f32 %v811_v0, %v310_v6  ;;  %vm333_vm12 = vcmp.eq.f32.partialorder %v332_v27, 8.507059e+37  ;;  %vm343_vm13 = vweird.f32 %v292_v5 }
  0xb9   :  { %v297_v9 = vadd.f32 %v809_v62, %v296_v7  ;;  %v350_v46 = vor.u32 1.1754944e-38, %v349_v34  ;;  %vm348_vm15 = vcmp.eq.f32.partialorder %v347_v37, 8.507059e+37 }
  0xba   :  { %v815_v10 = vpop.eup %814  ;;  %v312_v15 = vadd.f32 %v811_v0, %v311_v8 }
  0xbb   :  { %v324_v13 = vmul.f32 %v815_v10, %v291_v63  ;;  %v301_v19 = vsel %vm1122_vm2, %v809_v62, %v297_v9  ;;  %vm329_vm7 = vweird.f32 %v815_v10 }
  0xbc   :  { %v306_v29 = vsel %vm303_vm5, %v305_v22, %v301_v19  ;;  %v316_v30 = vsel %vm1128_vm6, %v811_v0, %v312_v15  ;;  %vm330_vm10 = vmor %vm328_vm9, %vm329_vm7 }
  0xbd   :  { %v817_v18 = vpop.eup %816  ;;  %v325_v21 = vsub.f32 1.0, %v324_v13  ;;  %v353_v38 = vmul.f32 %v306_v29, %v1092_v43  ;;  %v321_v39 = vsel %vm318_vm8, %v320_v32, %v316_v30 }
  0xbe   :  { %v339_v24 = vmul.f32 %v817_v18, %v292_v5  ;;  %vm344_vm11 = vweird.f32 %v817_v18  ;;  %v354_v47 = vmul.f32 %v321_v39, %v1095_v45 }
  0xbf   :  { %v326_v26 = vmul.f32 %v815_v10, %v325_v21  ;;  %vm345_vm14 = vmor %vm343_vm13, %vm344_vm11  ;;  %v357_v52 = vmul.f32 %v353_v38, %v258_v17 }
  0xc0   :  { %v340_v31 = vsub.f32 1.0, %v339_v24  ;;  %v358_v57 = vmul.f32 %v354_v47, %v272_v28 }
  0xc1   :  { %v327_v33 = vadd.f32 %v815_v10, %v326_v26 }
  0xc2   :  { %v341_v36 = vmul.f32 %v817_v18, %v340_v31 }
  0xc3   :  { %v331_v40 = vsel %vm330_vm10, %v815_v10, %v327_v33 }
  0xc4   :  { %v336_v41 = vsel %vm333_vm12, %v335_v35, %v331_v40  ;;  %v342_v42 = vadd.f32 %v817_v18, %v341_v36 }
  0xc5   :  { %v355_v44 = vmul.f32 %v336_v41, %v1110_v51 }
  0xc6   :  { %v346_v48 = vsel %vm345_vm14, %v817_v18, %v342_v42 }
  0xc7   :  { %v351_v50 = vsel %vm348_vm15, %v350_v46, %v346_v48  ;;  %v359_v53 = vmul.f32 %v355_v44, %v260_v49 }
  0xc8   :  { %v356_v43 = vmul.f32 %v351_v50, %v1113_v54 }
  0xc9   :  { %v363_v55 = vpack.c.bf16 %v359_v53, %v357_v52 }
  0xca   :  { %v360_v58 = vmul.f32 %v356_v43, %v274_v56 }
  0xcb   :  { %501 = vmatmul.bf16.vlgmr.msrb.gmra.mxu0 %v363_v55 }
  0xcc   :  { %v364_v59 = vpack.c.bf16 %v360_v58, %v358_v57 }
  0xce   :  { %515 = vmatmul.bf16.vlgmr.msrb.gmra.mxu1 %v364_v59 }
 0x148   :  { %v502_v51 = vpop.f32.mrf.mxu0 }
 0x14b   :  { %v516_v60 = vpop.f32.mrf.mxu1 }
 0x14c   :  { %v517_v61 = vadd.f32 %v516_v60, %v502_v51 }
 0x14e   :  { %530 = vst [vmem:[#allocation3] sm:$0xff] %v517_v61 }
 0x150   :  { %v504_v45 = vpop.f32.mrf.mxu0 }
 0x153   :  { %v518_v62 = vpop.f32.mrf.mxu1 }
 0x154   :  { %v519_v54 = vadd.f32 %v518_v62, %v504_v45 }
 0x156   :  { %531 = vst [vmem:[#allocation3 + $0x8] sm:$0xff] %v519_v54 }
 0x157   :  { %544 = dma.vmem_to_hbm [thread:$0]  %s537_s9, 256, %s539_s11, [#allocation4], %s845_s12, %s845_s12, %s846_s13  }
 0x158   :  { %842 = dma.done.wait [#allocation4], 256  }
 0x159   :  { %843 = vsyncadd [#allocation4], 4294967040 }
 0x15a   :  { %549 = vsyncpa [#allocation4], 1 }

</bundles_post_ra>
